<compile_context>
chip_gen: v6e
topology: v6e:2x2x1
jax: 0.10.0
libtpu: 0.0.40
codegen_flags: <defaults>
</compile_context>

<pallas_src>
import jax
import jax.numpy as jnp
import numpy as np
from jax.experimental import pallas as pl
from jax.experimental.pallas import tpu as pltpu


def _round_up(n, m):
    return ((n + m - 1) // m) * m


def _pad_axis(a, axis, target):
    pad = target - a.shape[axis]
    if pad == 0:
        return a
    widths = [(0, 0)] * a.ndim
    widths[axis] = (0, pad)
    return jnp.pad(a, widths)


def rwkv_channelmix_kernel(x_ref, xp_ref, xn_ref, tmix_ref, a_ref, b_ref,
                           kw_ref, rw_ref, vw_ref, o_ref):
    """One grid step = one (block_m, Cp) row tile of the flattened (B*T, C) input."""
    # Channel-mix prologue (VPU, f32): xm = x*time_mix + x_{t-1}*a + x_{t+1}*b
    xm = (x_ref[...] * tmix_ref[...]
          + xp_ref[...] * a_ref[...]
          + xn_ref[...] * b_ref[...])
    xm_bf = xm.astype(jnp.bfloat16)

    # MXU matmuls on pre-transposed bf16 weights, f32 accumulation.
    k = jnp.dot(xm_bf, kw_ref[...], preferred_element_type=jnp.float32)
    k = jnp.square(jnp.maximum(k, 0.0))                     # relu(k)^2 in f32
    kv = jnp.dot(k.astype(jnp.bfloat16), vw_ref[...],
                 preferred_element_type=jnp.float32)
    r = jnp.dot(xm_bf, rw_ref[...], preferred_element_type=jnp.float32)

    # Epilogue in f32 (EUP sigmoid + VPU mul); lane-dense store.
    o_ref[...] = (jax.nn.sigmoid(r) * kv).astype(o_ref.dtype)


def rwkv_channelmix(x, time_mix, combined_mix, key_w, recept_w, value_w,
                    *, block_m=256):
    B, T, C = x.shape
    H = key_w.shape[0]                       # hidden = 4 * n_embd

    # ---- wrapper-side layout plumbing (cheap XLA ops, run once, outside kernel) ----
    # Shifted activations; batch boundaries handled before flattening (B, T) -> M.
    zeros = jnp.zeros((B, 1, C), x.dtype)
    x_prev = jnp.concatenate([zeros, x[:, :-1, :]], axis=1)   # x_{t-1}, zero row at t=0
    x_next = jnp.concatenate([x[:, 1:, :], zeros], axis=1)    # x_{t+1}, zero row at t=T-1

    # Fold the C/2 channel-combine into per-channel coefficients.
    tmix = time_mix.reshape(1, C).astype(jnp.float32)
    cmix = combined_mix.reshape(1, C).astype(jnp.float32)
    ch = jnp.arange(C)[None, :]
    coef_a = (1.0 - tmix) + jnp.where(ch < C // 2, cmix, 0.0)   # multiplies x_{t-1}
    coef_b = jnp.where(ch >= C // 2, cmix, 0.0)                 # multiplies x_{t+1}

    # Pad channels to lane multiples (128) and flatten/pad rows to a tile multiple.
    Cp = _round_up(C, 128)
    Hp = _round_up(H, 128)
    M = B * T
    bm = block_m if M >= block_m else _round_up(M, 8)
    Mp = _round_up(M, bm)

    def prep_act(a):
        return _pad_axis(_pad_axis(a.reshape(M, C), 1, Cp), 0, Mp)

    xf, xpf, xnf = prep_act(x), prep_act(x_prev), prep_act(x_next)
    tmix_p = _pad_axis(tmix, 1, Cp)
    a_p = _pad_axis(coef_a, 1, Cp)
    b_p = _pad_axis(coef_b, 1, Cp)

    # Pre-transposed, zero-padded, bf16 weights (no in-kernel .T relayout).
    kw_t = _pad_axis(_pad_axis(key_w.T, 0, Cp), 1, Hp).astype(jnp.bfloat16)     # (Cp, Hp)
    rw_t = _pad_axis(_pad_axis(recept_w.T, 0, Cp), 1, Cp).astype(jnp.bfloat16)  # (Cp, Cp)
    vw_t = _pad_axis(_pad_axis(value_w.T, 0, Hp), 1, Cp).astype(jnp.bfloat16)   # (Hp, Cp)

    grid = (Mp // bm,)
    act_spec = pl.BlockSpec((bm, Cp), lambda i: (i, 0))
    coef_spec = pl.BlockSpec((1, Cp), lambda i: (0, 0))

    out = pl.pallas_call(
        rwkv_channelmix_kernel,
        out_shape=jax.ShapeDtypeStruct((Mp, Cp), x.dtype),
        grid=grid,
        in_specs=[
            act_spec, act_spec, act_spec,               # x, x_{t-1}, x_{t+1} tiles
            coef_spec, coef_spec, coef_spec,            # time_mix, a, b (f32)
            pl.BlockSpec((Cp, Hp), lambda i: (0, 0)),   # Wk^T  (bf16)
            pl.BlockSpec((Cp, Cp), lambda i: (0, 0)),   # Wr^T  (bf16)
            pl.BlockSpec((Hp, Cp), lambda i: (0, 0)),   # Wv^T  (bf16)
        ],
        out_specs=act_spec,
        compiler_params=pltpu.CompilerParams(
            dimension_semantics=("parallel",),          # row tiles shard across v7x's 2 TCs
            vmem_limit_bytes=48 * 1024 * 1024,          # headroom for real C/H, < v7x 64 MiB
        ),
    )(xf, xpf, xnf, tmix_p, a_p, b_p, kw_t, rw_t, vw_t)

    return out[:M, :C].reshape(B, T, C)


def rwkv_channelmix_ref(x, time_mix, combined_mix, key_w, recept_w, value_w):
    """Pure-JAX reference mirroring the PyTorch forward exactly (f32)."""
    B, T, C = x.shape
    zeros = jnp.zeros((B, 1, C), x.dtype)
    x_prev = jnp.concatenate([zeros, x[:, :-1, :]], axis=1)
    x_next = jnp.concatenate([x[:, 1:, :], zeros], axis=1)
    x_comb = jnp.concatenate([x_prev[:, :, : C // 2], x_next[:, :, C // 2 :]], axis=-1)
    xm = x * time_mix + x_prev * (1.0 - time_mix) + x_comb * combined_mix
    k = jnp.square(jnp.maximum(xm @ key_w.T, 0.0))
    kv = k @ value_w.T
    return jax.nn.sigmoid(xm @ recept_w.T) * kv


if __name__ == "__main__":
    B, T, C = 2, 8, 32          # batch, seq, n_embd
    H = 4 * C                   # hidden_sz

    key = jax.random.PRNGKey(0)
    k_x, k_key, k_rec, k_val = jax.random.split(key, 4)

    x = jax.random.normal(k_x, (B, T, C), dtype=jnp.float32)

    # Deterministic parameter init (shapes per the module's __init__):
    # time_mix: first C//2 entries 0, rest 1.
    time_mix = jnp.concatenate(
        [jnp.zeros((C // 2,), jnp.float32), jnp.ones((C - C // 2,), jnp.float32)]
    ).reshape(1, 1, C)
    combined_mix = jnp.full((1, 1, C), 0.01, dtype=jnp.float32)
    key_w = jax.random.normal(k_key, (H, C), dtype=jnp.float32) / np.sqrt(C)
    recept_w = jax.random.normal(k_rec, (C, C), dtype=jnp.float32) / np.sqrt(C)
    value_w = jax.random.normal(k_val, (C, H), dtype=jnp.float32) / np.sqrt(H)

    out = rwkv_channelmix(x, time_mix, combined_mix, key_w, recept_w, value_w)
    out = jax.block_until_ready(out)

    ref = rwkv_channelmix_ref(x, time_mix, combined_mix, key_w, recept_w, value_w)
    # bf16 MXU inputs (f32 accumulation): validate at bf16-appropriate tolerance.
    np.testing.assert_allclose(np.asarray(out), np.asarray(ref), rtol=3e-2, atol=3e-2)

    print("KERNEL_OK")
</pallas_src>

<mosaic_0001>
module attributes {stable_mosaic.version = 11 : i64} {
  func.func @rwkv_channelmix_kernel(%arg0: i32, %arg1: memref<16x128xf32, #tpu.memory_space<vmem>>, %arg2: memref<16x128xf32, #tpu.memory_space<vmem>>, %arg3: memref<16x128xf32, #tpu.memory_space<vmem>>, %arg4: memref<1x128xf32, #tpu.memory_space<vmem>>, %arg5: memref<1x128xf32, #tpu.memory_space<vmem>>, %arg6: memref<1x128xf32, #tpu.memory_space<vmem>>, %arg7: memref<128x128xbf16, #tpu.memory_space<vmem>>, %arg8: memref<128x128xbf16, #tpu.memory_space<vmem>>, %arg9: memref<128x128xbf16, #tpu.memory_space<vmem>>, %arg10: memref<16x128xf32, #tpu.memory_space<vmem>>) attributes {dimension_semantics = [#tpu.dimension_semantics<parallel>], iteration_bounds = array<i64: 1>, scalar_prefetch = 0 : i64, scratch_operands = 0 : i64, tpu.core_type = #tpu.core_type<tc>, window_params = [{transform_indices = @transform_0, window_bounds = array<i64: 16, 128>}, {transform_indices = @transform_1, window_bounds = array<i64: 16, 128>}, {transform_indices = @transform_2, window_bounds = array<i64: 16, 128>}, {pipeline_mode = #tpu.pipeline_mode<synchronous>, transform_indices = @transform_3, window_bounds = array<i64: 1, 128>}, {pipeline_mode = #tpu.pipeline_mode<synchronous>, transform_indices = @transform_4, window_bounds = array<i64: 1, 128>}, {pipeline_mode = #tpu.pipeline_mode<synchronous>, transform_indices = @transform_5, window_bounds = array<i64: 1, 128>}, {pipeline_mode = #tpu.pipeline_mode<synchronous>, transform_indices = @transform_6, window_bounds = array<i64: 128, 128>}, {pipeline_mode = #tpu.pipeline_mode<synchronous>, transform_indices = @transform_7, window_bounds = array<i64: 128, 128>}, {pipeline_mode = #tpu.pipeline_mode<synchronous>, transform_indices = @transform_8, window_bounds = array<i64: 128, 128>}, {transform_indices = @transform_9, window_bounds = array<i64: 16, 128>}]} {
    %c0 = arith.constant 0 : index
    %c0_0 = arith.constant 0 : index
    %0 = vector.load %arg1[%c0, %c0_0] : memref<16x128xf32, #tpu.memory_space<vmem>>, vector<16x128xf32>
    %c0_1 = arith.constant 0 : index
    %c0_2 = arith.constant 0 : index
    %1 = vector.load %arg4[%c0_1, %c0_2] : memref<1x128xf32, #tpu.memory_space<vmem>>, vector<1x128xf32>
    %2 = vector.broadcast %1 : vector<1x128xf32> to vector<16x128xf32>
    %3 = arith.mulf %0, %2 : vector<16x128xf32>
    %c0_3 = arith.constant 0 : index
    %c0_4 = arith.constant 0 : index
    %4 = vector.load %arg2[%c0_3, %c0_4] : memref<16x128xf32, #tpu.memory_space<vmem>>, vector<16x128xf32>
    %c0_5 = arith.constant 0 : index
    %c0_6 = arith.constant 0 : index
    %5 = vector.load %arg5[%c0_5, %c0_6] : memref<1x128xf32, #tpu.memory_space<vmem>>, vector<1x128xf32>
    %6 = vector.broadcast %5 : vector<1x128xf32> to vector<16x128xf32>
    %7 = arith.mulf %4, %6 : vector<16x128xf32>
    %8 = arith.addf %3, %7 : vector<16x128xf32>
    %c0_7 = arith.constant 0 : index
    %c0_8 = arith.constant 0 : index
    %9 = vector.load %arg3[%c0_7, %c0_8] : memref<16x128xf32, #tpu.memory_space<vmem>>, vector<16x128xf32>
    %c0_9 = arith.constant 0 : index
    %c0_10 = arith.constant 0 : index
    %10 = vector.load %arg6[%c0_9, %c0_10] : memref<1x128xf32, #tpu.memory_space<vmem>>, vector<1x128xf32>
    %11 = vector.broadcast %10 : vector<1x128xf32> to vector<16x128xf32>
    %12 = arith.mulf %9, %11 : vector<16x128xf32>
    %13 = arith.addf %8, %12 : vector<16x128xf32>
    %14 = arith.truncf %13 : vector<16x128xf32> to vector<16x128xbf16>
    %c0_11 = arith.constant 0 : index
    %c0_12 = arith.constant 0 : index
    %15 = vector.load %arg7[%c0_11, %c0_12] : memref<128x128xbf16, #tpu.memory_space<vmem>>, vector<128x128xbf16>
    %cst = arith.constant dense<0.000000e+00> : vector<16x128xf32>
    %16 = tpu.matmul %14, %15, %cst {dimension_numbers = #tpu.dot_dimension_numbers<[1], [0], [0], [1], [0, 0, 1, 1], [], []>} : vector<16x128xbf16>, vector<128x128xbf16>, vector<16x128xf32> -> vector<16x128xf32>
    %cst_13 = arith.constant 0.000000e+00 : f32
    %17 = vector.broadcast %cst_13 : f32 to vector<16x128xf32>
    %18 = arith.maximumf %16, %17 : vector<16x128xf32>
    %19 = arith.mulf %18, %18 : vector<16x128xf32>
    %20 = arith.truncf %19 : vector<16x128xf32> to vector<16x128xbf16>
    %c0_14 = arith.constant 0 : index
    %c0_15 = arith.constant 0 : index
    %21 = vector.load %arg9[%c0_14, %c0_15] : memref<128x128xbf16, #tpu.memory_space<vmem>>, vector<128x128xbf16>
    %cst_16 = arith.constant dense<0.000000e+00> : vector<16x128xf32>
    %22 = tpu.matmul %20, %21, %cst_16 {dimension_numbers = #tpu.dot_dimension_numbers<[1], [0], [0], [1], [0, 0, 1, 1], [], []>} : vector<16x128xbf16>, vector<128x128xbf16>, vector<16x128xf32> -> vector<16x128xf32>
    %c0_17 = arith.constant 0 : index
    %c0_18 = arith.constant 0 : index
    %23 = vector.load %arg8[%c0_17, %c0_18] : memref<128x128xbf16, #tpu.memory_space<vmem>>, vector<128x128xbf16>
    %cst_19 = arith.constant dense<0.000000e+00> : vector<16x128xf32>
    %24 = tpu.matmul %14, %23, %cst_19 {dimension_numbers = #tpu.dot_dimension_numbers<[1], [0], [0], [1], [0, 0, 1, 1], [], []>} : vector<16x128xbf16>, vector<128x128xbf16>, vector<16x128xf32> -> vector<16x128xf32>
    %25 = arith.negf %24 : vector<16x128xf32>
    %26 = math.exp %25 : vector<16x128xf32>
    %cst_20 = arith.constant 1.000000e+00 : f32
    %27 = vector.broadcast %cst_20 : f32 to vector<16x128xf32>
    %28 = arith.addf %27, %26 : vector<16x128xf32>
    %29 = arith.divf %27, %28 : vector<16x128xf32>
    %30 = arith.mulf %29, %22 : vector<16x128xf32>
    %c0_21 = arith.constant 0 : index
    %c0_22 = arith.constant 0 : index
    %31 = vector.load %arg10[%c0_21, %c0_22] : memref<16x128xf32, #tpu.memory_space<vmem>>, vector<16x128xf32>
    tpu.vector_store %arg10[%c0_21, %c0_22], %30 {strides = array<i32>} : memref<16x128xf32, #tpu.memory_space<vmem>>, vector<16x128xf32>,
    return
  }
  func.func @transform_0(%arg0: i32) -> (i32, i32) {
    %c0_i32 = arith.constant 0 : i32
    %c0_i32_0 = arith.constant 0 : i32
    return %arg0, %c0_i32 : i32, i32
  }
  func.func @transform_1(%arg0: i32) -> (i32, i32) {
    %c0_i32 = arith.constant 0 : i32
    %c0_i32_0 = arith.constant 0 : i32
    return %arg0, %c0_i32 : i32, i32
  }
  func.func @transform_2(%arg0: i32) -> (i32, i32) {
    %c0_i32 = arith.constant 0 : i32
    %c0_i32_0 = arith.constant 0 : i32
    return %arg0, %c0_i32 : i32, i32
  }
  func.func @transform_3(%arg0: i32) -> (i32, i32) {
    %c0_i32 = arith.constant 0 : i32
    %c0_i32_0 = arith.constant 0 : i32
    %c0_i32_1 = arith.constant 0 : i32
    return %c0_i32, %c0_i32_0 : i32, i32
  }
  func.func @transform_4(%arg0: i32) -> (i32, i32) {
    %c0_i32 = arith.constant 0 : i32
    %c0_i32_0 = arith.constant 0 : i32
    %c0_i32_1 = arith.constant 0 : i32
    return %c0_i32, %c0_i32_0 : i32, i32
  }
  func.func @transform_5(%arg0: i32) -> (i32, i32) {
    %c0_i32 = arith.constant 0 : i32
    %c0_i32_0 = arith.constant 0 : i32
    %c0_i32_1 = arith.constant 0 : i32
    return %c0_i32, %c0_i32_0 : i32, i32
  }
  func.func @transform_6(%arg0: i32) -> (i32, i32) {
    %c0_i32 = arith.constant 0 : i32
    %c0_i32_0 = arith.constant 0 : i32
    %c0_i32_1 = arith.constant 0 : i32
    return %c0_i32, %c0_i32_0 : i32, i32
  }
  func.func @transform_7(%arg0: i32) -> (i32, i32) {
    %c0_i32 = arith.constant 0 : i32
    %c0_i32_0 = arith.constant 0 : i32
    %c0_i32_1 = arith.constant 0 : i32
    return %c0_i32, %c0_i32_0 : i32, i32
  }
  func.func @transform_8(%arg0: i32) -> (i32, i32) {
    %c0_i32 = arith.constant 0 : i32
    %c0_i32_0 = arith.constant 0 : i32
    %c0_i32_1 = arith.constant 0 : i32
    return %c0_i32, %c0_i32_0 : i32, i32
  }
  func.func @transform_9(%arg0: i32) -> (i32, i32) {
    %c0_i32 = arith.constant 0 : i32
    %c0_i32_0 = arith.constant 0 : i32
    return %arg0, %c0_i32 : i32, i32
  }
}

</mosaic_0001>

<bundles_post_ra>
// kernel: tpu_custom_call.1
= control target key start
LH: loop header
LB: loop body
LE: loop exit
PB: predicated region body
PF: predicated region fallthrough
CT: control target
= control target key end

     0   :  { %14 = vsyncpa [#allocation3], 0  ;;  %s965_s0 = inlined_call_operand.hbm [shape: f32[16,128], index: 0, kind: input, shape index: {}]   ;;  %s966_s1 = inlined_call_operand.hbm [shape: f32[16,128], index: 1, kind: input, shape index: {}]   ;;  %s967_s2 = inlined_call_operand.hbm [shape: f32[16,128], index: 2, kind: input, shape index: {}]   ;;  %s968_s3 = inlined_call_operand.vmem [shape: f32[1,128], index: 3, kind: input, shape index: {}]   ;;  %s969_s4 = inlined_call_operand.vmem [shape: f32[1,128], index: 4, kind: input, shape index: {}]   ;;  %s970_s5 = inlined_call_operand.vmem [shape: f32[1,128], index: 5, kind: input, shape index: {}]   ;;  %s971_s6 = inlined_call_operand.hbm [shape: bf16[128,128], index: 6, kind: input, shape index: {}]   ;;  %s972_s7 = inlined_call_operand.hbm [shape: bf16[128,128], index: 7, kind: input, shape index: {}]   ;;  %s973_s8 = inlined_call_operand.hbm [shape: bf16[128,128], index: 8, kind: input, shape index: {}]   ;;  %s974_s9 = inlined_call_operand.hbm [shape: f32[16,128], index: 9, kind: output, shape index: {}]  }
   0x1   :  { %15 = vsyncpa [#allocation6], 0 }
   0x2   :  { %16 = vsyncpa [#allocation9], 0 }
   0x3   :  { %17 = vsyncpa [#allocation12], 0 }
   0x4   :  { %18 = vsyncpa [#allocation4], 0  ;;  %s821_s30 = smov [#allocation5]   ;;  %s822_s11 = smov [#allocation8]  }
   0x5   :  { %s36_s10 = sshll.u32 %s821_s30, 4  ;;  %s66_s12 = sshll.u32 %s822_s11, 4  ;;  %s37_s10 = int_to_ptr.vmem [resolvable:$true] %s36_s10  ;;  %s67_s12 = int_to_ptr.vmem [resolvable:$true] %s66_s12 }
   0x6   :  { %s679_s13 = scalar_lea.vmem %s37_s10, 256  ;;  %p684_p1 = scmp.lt.s32.totalorder %s37_s10, %s37_s10 }
   0x7   :  { %p680_p0 = scmp.ne.s32.totalorder %s37_s10, %s679_s13  ;;  %p685_p2 = scmp.lt.s32.totalorder %s679_s13, %s679_s13 }
   0x9   :  { %p686_p3 = por %p685_p2, %p684_p1 }
   0xb   :  { %p687_p4 = pnand %p686_p3, %p680_p0 }
   0xd   :  { %690 = shalt.err (!%p687_p4)
}
   0xe   :  { %s823_s14 = smov 128   ;;  %s824_s15 = smov 8  }
   0xf   :  { %42 = dma.hbm_to_vmem [thread:$0]  %s966_s1, 256, %s37_s10, [#allocation6], %s823_s14, %s823_s14, %s824_s15  }
  0x10   :  { %s699_s18 = scalar_lea.vmem %s67_s12, 1024  ;;  %p704_p6 = scmp.lt.s32.totalorder %s67_s12, %s67_s12 }
  0x11   :  { %p700_p5 = scmp.ne.s32.totalorder %s67_s12, %s699_s18  ;;  %p705_p7 = scmp.lt.s32.totalorder %s699_s18, %s699_s18 }
  0x13   :  { %p706_p8 = por %p705_p7, %p704_p6 }
  0x15   :  { %p707_p9 = pnand %p706_p8, %p700_p5 }
  0x17   :  { %710 = shalt.err (!%p707_p9)
}
  0x18   :  { %s825_s19 = smov 64   ;;  %s826_s20 = smov 4  }
  0x19   :  { %72 = dma.hbm_to_vmem [thread:$0]  %s971_s6, 1024, %s67_s12, [#allocation9], %s825_s19, %s825_s19, %s826_s20  }
  0x1a   :  { %s827_s23 = smov [#allocation2]   ;;  %s828_s25 = smov [#allocation7]  }
  0x1b   :  { %s24_s24 = sshll.u32 %s827_s23, 4  ;;  %s48_s1 = sshll.u32 %s828_s25, 4  ;;  %s25_s24 = int_to_ptr.vmem [resolvable:$true] %s24_s24  ;;  %s49_s1 = int_to_ptr.vmem [resolvable:$true] %s48_s1 }
  0x1c   :  { %s719_s26 = scalar_lea.vmem %s25_s24, 256  ;;  %p724_p11 = scmp.lt.s32.totalorder %s25_s24, %s25_s24 }
  0x1d   :  { %p720_p10 = scmp.ne.s32.totalorder %s25_s24, %s719_s26  ;;  %p725_p12 = scmp.lt.s32.totalorder %s719_s26, %s719_s26 }
  0x1f   :  { %p726_p13 = por %p725_p12, %p724_p11 }
  0x21   :  { %p727_p0 = pnand %p726_p13, %p720_p10 }
  0x23   :  { %730 = shalt.err (!%p727_p0)
}
  0x24   :  { %30 = dma.hbm_to_vmem [thread:$0]  %s965_s0, 256, %s25_s24, [#allocation3], %s823_s14, %s823_s14, %s824_s15  }
  0x25   :  { %s739_s6 = scalar_lea.vmem %s49_s1, 256  ;;  %p744_p2 = scmp.lt.s32.totalorder %s49_s1, %s49_s1 }
  0x26   :  { %p740_p1 = scmp.ne.s32.totalorder %s49_s1, %s739_s6  ;;  %p745_p3 = scmp.lt.s32.totalorder %s739_s6, %s739_s6 }
  0x28   :  { %p746_p4 = por %p745_p3, %p744_p2 }
  0x2a   :  { %p747_p5 = pnand %p746_p4, %p740_p1 }
  0x2c   :  { %750 = shalt.err (!%p747_p5)
}
  0x2d   :  { %54 = dma.hbm_to_vmem [thread:$0]  %s967_s2, 256, %s49_s1, [#allocation6], %s823_s14, %s823_s14, %s824_s15  }
  0x2e   :  { %s829_s10 = smov [#allocation10]   ;;  %s830_s12 = smov [#allocation11]  }
  0x2f   :  { %s78_s11 = sshll.u32 %s829_s10, 4  ;;  %s90_s13 = sshll.u32 %s830_s12, 4  ;;  %s79_s11 = int_to_ptr.vmem [resolvable:$true] %s78_s11  ;;  %s91_s13 = int_to_ptr.vmem [resolvable:$true] %s90_s13 }
  0x30   :  { %s759_s0 = scalar_lea.vmem %s79_s11, 1024  ;;  %p764_p7 = scmp.lt.s32.totalorder %s79_s11, %s79_s11 }
  0x31   :  { %p760_p6 = scmp.ne.s32.totalorder %s79_s11, %s759_s0  ;;  %p765_p8 = scmp.lt.s32.totalorder %s759_s0, %s759_s0 }
  0x33   :  { %p766_p9 = por %p765_p8, %p764_p7 }
  0x35   :  { %p767_p10 = pnand %p766_p9, %p760_p6 }
  0x37   :  { %770 = shalt.err (!%p767_p10)
}
  0x38   :  { %84 = dma.hbm_to_vmem [thread:$0]  %s972_s7, 1024, %s79_s11, [#allocation9], %s825_s19, %s825_s19, %s826_s20  }
  0x39   :  { %s779_s2 = scalar_lea.vmem %s91_s13, 1024  ;;  %p784_p12 = scmp.lt.s32.totalorder %s91_s13, %s91_s13 }
  0x3a   :  { %p780_p11 = scmp.ne.s32.totalorder %s91_s13, %s779_s2  ;;  %p785_p13 = scmp.lt.s32.totalorder %s779_s2, %s779_s2 }
  0x3c   :  { %p786_p0 = por %p785_p13, %p784_p12 }
  0x3e   :  { %p787_p1 = pnand %p786_p0, %p780_p11 }
  0x40   :  { %790 = shalt.err (!%p787_p1)
}
  0x41   :  { %96 = dma.hbm_to_vmem [thread:$0]  %s973_s8, 1024, %s91_s13, [#allocation12], %s825_s19, %s825_s19, %s826_s20  }
  0x42   :  { %811 = dma.done.wait [#allocation3], 256  }
  0x43   :  { %812 = vsyncadd [#allocation3], 4294967040 }
  0x44   :  { %813 = dma.done.wait [#allocation6], 512  }
  0x45   :  { %814 = vsyncadd [#allocation6], 4294966784 }
  0x46   :  { %815 = dma.done.wait [#allocation9], 2048  }
  0x47   :  { %816 = vsyncadd [#allocation9], 4294965248 }
  0x48   :  { %817 = dma.done.wait [#allocation12], 1024  }
  0x49   :  { %818 = vsyncadd [#allocation12], 4294966272  ;;  %v831_v0 = vmov 0.0   ;;  %vm832_vm0 = vmmov 0   ;;  %v639_v1 = vld [vmem:[#allocation8 + $0x38] sm:$0xff]   ;;  %v640_v2 = vld [vmem:[#allocation8 + $0x30] sm:$0xff]  }
  0x4a   :  { %566 = vmatprep.subr.bf16.mxu0 %v831_v0  ;;  %582 = vmatprep.mubr.msk.bf16.mxu0 %vm832_vm0, %v831_v0  ;;  %v641_v3 = vld [vmem:[#allocation8 + $0x28] sm:$0xff]   ;;  %v642_v4 = vld [vmem:[#allocation8 + $0x20] sm:$0xff]   ;;  %v643_v5 = vld [vmem:[#allocation8 + $0x18] sm:$0xff]  }
  0x4b   :  { %586 = vmatprep.subr.bf16.mxu1 %v831_v0  ;;  %602 = vmatprep.mubr.msk.bf16.mxu1 %vm832_vm0, %v831_v0  ;;  %v116_v6 = vld [vmem:[#allocation2] sm:$0xff]  ;;  %v117_v7 = vld [vmem:[#allocation2 + $0x8] sm:$0xff]  ;;  %v127_v9 = vld [vmem:[#allocation5] sm:$0xff] }
  0x4c   :  { %567 = vmatpush3.bf16.msra.mxu0 %v639_v1  ;;  %v510_v8 = vld [vmem:[%s968_s3] ss:$0 sm:$0xff]  ;;  %v128_v10 = vld [vmem:[#allocation5 + $0x8] sm:$0xff]  ;;  %v141_v18 = vld [vmem:[#allocation7 + $0x8] sm:$0xff]  ;;  %s833_s3 = smov [#allocation13]  }
  0x4d   :  { %568 = vmatprep.subr.bf16.mxu0 %v831_v0  ;;  %v511_v11 = vld [vmem:[%s969_s4] ss:$0 sm:$0xff]  ;;  %v125_v14 = vmul.f32 %v510_v8, %v116_v6  ;;  %v126_v15 = vmul.f32 %v510_v8, %v117_v7  ;;  %v655_v20 = vld [vmem:[#allocation11 + $0x38] sm:$0xff]   ;;  %v645_v26 = vld [vmem:[#allocation8 + $0x8] sm:$0xff]   ;;  %s495_s4 = sshll.u32 %s833_s3, 4  ;;  %s496_s4 = int_to_ptr.vmem [resolvable:$true] %s495_s4 }
  0x4e   :  { %v644_v12 = vld [vmem:[#allocation8 + $0x10] sm:$0xff]   ;;  %v136_v16 = vmul.f32 %v511_v11, %v127_v9  ;;  %v137_v17 = vmul.f32 %v511_v11, %v128_v10  ;;  %587 = vmatpush3.bf16.msra.mxu1 %v655_v20  ;;  %v657_v27 = vld [vmem:[#allocation11 + $0x28] sm:$0xff]   ;;  %v646_v30 = vld [vmem:[#allocation8] sm:$0xff]   ;;  %p796_p3 = scmp.lt.s32.totalorder %s496_s4, %s496_s4 }
  0x4f   :  { %v140_v13 = vld [vmem:[#allocation7] sm:$0xff]  ;;  %588 = vmatprep.subr.bf16.mxu1 %v831_v0  ;;  %v658_v32 = vld [vmem:[#allocation11 + $0x20] sm:$0xff]   ;;  %v647_v33 = vld [vmem:[#allocation10 + $0x38] sm:$0xff]  }
  0x50   :  { %569 = vmatpush3.bf16.msra.mxu0 %v640_v2  ;;  %v512_v19 = vld [vmem:[%s970_s5] ss:$0 sm:$0xff]  ;;  %v138_v21 = vadd.f32 %v136_v16, %v125_v14  ;;  %v139_v22 = vadd.f32 %v137_v17, %v126_v15  ;;  %v659_v34 = vld [vmem:[#allocation11 + $0x18] sm:$0xff]   ;;  %v649_v36 = vld [vmem:[#allocation10 + $0x28] sm:$0xff]   ;;  %s791_s5 = scalar_lea.vmem %s496_s4, 256 }
  0x51   :  { %570 = vmatprep.subr.bf16.mxu0 %v831_v0  ;;  %v149_v23 = vmul.f32 %v512_v19, %v140_v13  ;;  %v150_v24 = vmul.f32 %v512_v19, %v141_v18  ;;  %v656_v25 = vld [vmem:[#allocation11 + $0x30] sm:$0xff]   ;;  %v650_v37 = vld [vmem:[#allocation10 + $0x20] sm:$0xff]   ;;  %v651_v38 = vld [vmem:[#allocation10 + $0x18] sm:$0xff]   ;;  %p792_p2 = scmp.ne.s32.totalorder %s496_s4, %s791_s5  ;;  %p797_p4 = scmp.lt.s32.totalorder %s791_s5, %s791_s5 }
  0x52   :  { %589 = vmatpush3.bf16.msra.mxu1 %v656_v25  ;;  %v648_v35 = vld [vmem:[#allocation10 + $0x30] sm:$0xff]   ;;  %v653_v40 = vld [vmem:[#allocation10 + $0x8] sm:$0xff]   ;;  %v654_v41 = vld [vmem:[#allocation10] sm:$0xff]  }
  0x53   :  { %v151_v28 = vadd.f32 %v149_v23, %v138_v21  ;;  %v152_v29 = vadd.f32 %v150_v24, %v139_v22  ;;  %590 = vmatprep.subr.bf16.mxu1 %v831_v0  ;;  %v652_v39 = vld [vmem:[#allocation10 + $0x10] sm:$0xff]   ;;  %v661_v43 = vld [vmem:[#allocation11 + $0x8] sm:$0xff]   ;;  %v662_v44 = vld [vmem:[#allocation11] sm:$0xff]   ;;  %p798_p5 = por %p797_p4, %p796_p3 }
  0x54   :  { %571 = vmatpush3.bf16.msra.mxu0 %v641_v3  ;;  %v660_v42 = vld [vmem:[#allocation11 + $0x10] sm:$0xff]  }
  0x55   :  { %572 = vmatprep.subr.bf16.mxu0 %v831_v0  ;;  %v153_v31 = vpack.c.bf16 %v152_v29, %v151_v28  ;;  %p799_p6 = pnand %p798_p5, %p792_p2 }
  0x56   :  { %591 = vmatpush3.bf16.msra.mxu1 %v657_v27 }
  0x57   :  { %592 = vmatprep.subr.bf16.mxu1 %v831_v0 }
  0x58   :  { %573 = vmatpush3.bf16.msra.mxu0 %v642_v4 }
  0x59   :  { %574 = vmatprep.subr.bf16.mxu0 %v831_v0 }
  0x5a   :  { %593 = vmatpush3.bf16.msra.mxu1 %v658_v32 }
  0x5b   :  { %594 = vmatprep.subr.bf16.mxu1 %v831_v0 }
  0x5c   :  { %575 = vmatpush3.bf16.msra.mxu0 %v643_v5 }
  0x5d   :  { %576 = vmatprep.subr.bf16.mxu0 %v831_v0 }
  0x5e   :  { %595 = vmatpush3.bf16.msra.mxu1 %v659_v34 }
  0x5f   :  { %596 = vmatprep.subr.bf16.mxu1 %v831_v0 }
  0x60   :  { %577 = vmatpush3.bf16.msra.mxu0 %v644_v12 }
  0x61   :  { %578 = vmatprep.subr.bf16.mxu0 %v831_v0 }
  0x62   :  { %597 = vmatpush3.bf16.msra.mxu1 %v660_v42 }
  0x63   :  { %598 = vmatprep.subr.bf16.mxu1 %v831_v0 }
  0x64   :  { %579 = vmatpush3.bf16.msra.mxu0 %v645_v26 }
  0x65   :  { %580 = vmatprep.subr.bf16.mxu0 %v831_v0 }
  0x66   :  { %599 = vmatpush3.bf16.msra.mxu1 %v661_v43 }
  0x67   :  { %600 = vmatprep.subr.bf16.mxu1 %v831_v0 }
  0x68   :  { %581 = vmatpush3.bf16.msra.mxu0 %v646_v30 }
  0x69   :  { %606 = vmatprep.subr.bf16.mxu0 %v831_v0 }
  0x6a   :  { %601 = vmatpush3.bf16.msra.mxu1 %v662_v44 }
  0x6b   :  { %583 = vmatmul.mubr.bf16.vlgmr.msra.gmra.mxu0 %v153_v31 }
  0x6c   :  { %607 = vmatpush3.bf16.msra.mxu0 %v647_v33  ;;  %622 = vmatprep.mubr.msk.bf16.mxu0 %vm832_vm0, %v831_v0 }
  0x6d   :  { %608 = vmatprep.subr.bf16.mxu0 %v831_v0 }
  0x70   :  { %609 = vmatpush3.bf16.msra.mxu0 %v648_v35 }
  0x71   :  { %610 = vmatprep.subr.bf16.mxu0 %v831_v0 }
  0x74   :  { %611 = vmatpush3.bf16.msra.mxu0 %v649_v36 }
  0x75   :  { %612 = vmatprep.subr.bf16.mxu0 %v831_v0 }
  0x78   :  { %613 = vmatpush3.bf16.msra.mxu0 %v650_v37 }
  0x79   :  { %614 = vmatprep.subr.bf16.mxu0 %v831_v0 }
  0x7c   :  { %615 = vmatpush3.bf16.msra.mxu0 %v651_v38 }
  0x7d   :  { %616 = vmatprep.subr.bf16.mxu0 %v831_v0 }
  0x80   :  { %617 = vmatpush3.bf16.msra.mxu0 %v652_v39 }
  0x81   :  { %618 = vmatprep.subr.bf16.mxu0 %v831_v0 }
  0x84   :  { %619 = vmatpush3.bf16.msra.mxu0 %v653_v40 }
  0x85   :  { %620 = vmatprep.subr.bf16.mxu0 %v831_v0 }
  0x88   :  { %621 = vmatpush3.bf16.msra.mxu0 %v654_v41 }
  0x8b   :  { %623 = vmatmul.mubr.bf16.vlgmr.msra.gmra.mxu0 %v153_v31 }
 0x12b   :  { %v252_v45 = vpop.f32.mrf.mxu0 }
 0x12c   :  { %v259_v47 = vmax.f32 %v252_v45, 0.0 }
 0x12d   :  { %v584_v46 = vpop.f32.mrf.mxu0 }
 0x12e   :  { %v261_v51 = vmul.f32 %v259_v47, %v259_v47 }
 0x12f   :  { %v255_v48 = vpop.f32.mrf.mxu0 }
 0x130   :  { %v260_v49 = vmax.f32 %v255_v48, 0.0 }
 0x131   :  { %v585_v50 = vpop.f32.mrf.mxu0 }
 0x132   :  { %v262_v52 = vmul.f32 %v260_v49, %v260_v49 }
 0x134   :  { %v263_v53 = vpack.c.bf16 %v262_v52, %v261_v51 }
 0x136   :  { %603 = vmatmul.mubr.bf16.vlgmr.msra.gmra.mxu1 %v263_v53 }
 0x14b   :  { %v467_v54 = vpop.f32.mrf.mxu0 }
 0x14c   :  { %v537_v58 = vmul.f32 -1.442695, %v467_v54 }
 0x14d   :  { %v624_v55 = vpop.f32.mrf.mxu0 }
 0x14e   :  { %663 = vpow2.f32 %v537_v58 }
 0x14f   :  { %v470_v56 = vpop.f32.mrf.mxu0 }
 0x150   :  { %v538_v59 = vmul.f32 -1.442695, %v470_v56 }
 0x151   :  { %v625_v57 = vpop.f32.mrf.mxu0 }
 0x152   :  { %665 = vpow2.f32 %v538_v59 }
 0x15b   :  { %v664_v60 = vpop.eup %663 }
 0x15c   :  { %v480_v61 = vadd.f32 1.0, %v664_v60 }
 0x15e   :  { %667 = vrcp.f32 %v480_v61 }
 0x15f   :  { %v666_v62 = vpop.eup %665 }
 0x160   :  { %v481_v63 = vadd.f32 1.0, %v666_v62 }
 0x162   :  { %669 = vrcp.f32 %v481_v63 }
 0x16b   :  { %v668_v0 = vpop.eup %667 }
 0x16f   :  { %v670_v4 = vpop.eup %669 }
 0x1f6   :  { %v362_v1 = vpop.f32.mrf.mxu1 }
 0x1f7   :  { %v486_v2 = vmul.f32 %v668_v0, %v362_v1 }
 0x1f8   :  { %v604_v3 = vpop.f32.mrf.mxu1 }
 0x1f9   :  { %488 = vst [vmem:[#allocation13] sm:$0xff] %v486_v2 }
 0x1fa   :  { %v365_v5 = vpop.f32.mrf.mxu1 }
 0x1fb   :  { %v487_v6 = vmul.f32 %v670_v4, %v365_v5 }
 0x1fc   :  { %v605_v7 = vpop.f32.mrf.mxu1 }
 0x1fd   :  { %489 = vst [vmem:[#allocation13 + $0x8] sm:$0xff] %v487_v6 }
 0x1fe   :  { %802 = shalt.err (!%p799_p6)
}
 0x1ff   :  { %501 = dma.vmem_to_hbm [thread:$0]  %s496_s4, 256, %s974_s9, [#allocation4], %s823_s14, %s823_s14, %s824_s15  }
 0x200   :  { %819 = dma.done.wait [#allocation4], 256  }
 0x201   :  { %820 = vsyncadd [#allocation4], 4294967040 }
 0x202   :  { %505 = vsyncpa [#allocation3], 1 }
 0x203   :  { %506 = vsyncpa [#allocation6], 1 }
 0x204   :  { %507 = vsyncpa [#allocation9], 1 }
 0x205   :  { %508 = vsyncpa [#allocation12], 1 }
 0x206   :  { %509 = vsyncpa [#allocation4], 1 }

</bundles_post_ra>
